<compile_context>
chip_gen: v6e
topology: v6e:2x2x1
jax: 0.10.0
libtpu: 0.0.40
codegen_flags: <defaults>
</compile_context>

<pallas_src>
import math

import jax
import jax.numpy as jnp
from jax.experimental import pallas as pl
from jax.experimental.pallas import tpu as pltpu


def _round_up(x: int, m: int) -> int:
    return (x + m - 1) // m * m


def _pad2d(a, rows, cols):
    r, c = a.shape
    if r == rows and c == cols:
        return a
    return jnp.pad(a, ((0, rows - r), (0, cols - c)))


def bayesian_linear_kernel(x_ref, wmu_ref, wrho_ref, epsw_ref,
                           bmu_ref, brho_ref, epsb_ref, o_ref, acc_ref):
    k = pl.program_id(2)

    @pl.when(k == 0)
    def _zero_acc():
        acc_ref[...] = jnp.zeros_like(acc_ref)

    # Sample the (TK, TN) weight tile: W = mu + exp(rho) * eps.
    # Weights are K-major (I, O), so the MXU consumes the sampled tile
    # directly -- no in-kernel transpose.
    w = wmu_ref[...] + jnp.exp(wrho_ref[...]) * epsw_ref[...]
    acc_ref[...] += jnp.dot(x_ref[...], w, preferred_element_type=jnp.float32)

    @pl.when(k == pl.num_programs(2) - 1)
    def _finalize():
        # Bias sampling hoisted out of the per-k path: done once per (i, j).
        b = bmu_ref[...] + jnp.exp(brho_ref[...]) * epsb_ref[...]   # (1, TN)
        o_ref[...] = (acc_ref[...] + b).astype(o_ref.dtype)


def bayesian_linear_forward(x, weight_mu, weight_rho, eps_w,
                            bias_mu, bias_rho, eps_b,
                            *, tile_m=128, tile_n=256, tile_k=512):
    """y = x @ (weight_mu + exp(weight_rho)*eps_w).T + (bias_mu + exp(bias_rho)*eps_b)."""
    B, I = x.shape
    O, _ = weight_mu.shape

    # ---- tile sizes: (8,128)-aligned, capped at the requested maxima ----
    tm = min(_round_up(B, 8), _round_up(tile_m, 8))
    tn = min(_round_up(O, 128), _round_up(tile_n, 128))
    tk = min(_round_up(I, 128), _round_up(tile_k, 128))

    Bp = _round_up(B, tm)
    Op = _round_up(O, tn)
    Ip = _round_up(I, tk)

    # ---- layout plumbing (one-time, outside the hot loop) ----
    # Pre-transpose weights to (I, O) so the kernel needs no XLU transpose.
    # Zero-padding is exact: padded rho=0 -> std=1, padded eps=0 -> W_pad = 0.
    x_p = _pad2d(x, Bp, Ip)
    wmu_t = _pad2d(weight_mu.T, Ip, Op)
    wrho_t = _pad2d(weight_rho.T, Ip, Op)
    epsw_t = _pad2d(eps_w.T, Ip, Op)
    bmu_p = _pad2d(bias_mu.reshape(1, O), 1, Op)
    brho_p = _pad2d(bias_rho.reshape(1, O), 1, Op)
    epsb_p = _pad2d(eps_b.reshape(1, O), 1, Op)

    grid = (Bp // tm, Op // tn, Ip // tk)

    out_padded = pl.pallas_call(
        bayesian_linear_kernel,
        out_shape=jax.ShapeDtypeStruct((Bp, Op), jnp.float32),
        grid_spec=pltpu.PrefetchScalarGridSpec(
            num_scalar_prefetch=0,
            grid=grid,
            in_specs=[
                pl.BlockSpec((tm, tk), lambda i, j, k: (i, k)),   # x
                pl.BlockSpec((tk, tn), lambda i, j, k: (k, j)),   # weight_mu^T
                pl.BlockSpec((tk, tn), lambda i, j, k: (k, j)),   # weight_rho^T
                pl.BlockSpec((tk, tn), lambda i, j, k: (k, j)),   # eps_w^T
                pl.BlockSpec((1, tn), lambda i, j, k: (0, j)),    # bias_mu
                pl.BlockSpec((1, tn), lambda i, j, k: (0, j)),    # bias_rho
                pl.BlockSpec((1, tn), lambda i, j, k: (0, j)),    # eps_b
            ],
            out_specs=pl.BlockSpec((tm, tn), lambda i, j, k: (i, j)),
            scratch_shapes=[pltpu.VMEM((tm, tn), jnp.float32)],
        ),
        compiler_params=pltpu.CompilerParams(
            # M- and N-tile axes shard across TensorCores (v7x megacore);
            # the K reduction stays sequential ("arbitrary", last).
            dimension_semantics=("parallel", "parallel", "arbitrary")),
    )(x_p, wmu_t, wrho_t, epsw_t, bmu_p, brho_p, epsb_p)

    return out_padded[:B, :O]


def init_params(key, in_features, out_features):
    """Deterministic re-implementation of BayesianLinear.reset_parameters()."""
    k_w, k_b = jax.random.split(key)
    fan_in = in_features
    # kaiming_uniform_(a=sqrt(5)) -> bound = sqrt(6/((1+a^2)*fan_in)) = 1/sqrt(fan_in)
    bound_w = math.sqrt(6.0 / ((1.0 + 5.0) * fan_in))
    weight_mu = jax.random.uniform(
        k_w, (out_features, in_features), jnp.float32, -bound_w, bound_w)
    weight_rho = jnp.full((out_features, in_features), -4.6, jnp.float32)
    bound_b = 1.0 / math.sqrt(fan_in)
    bias_mu = jax.random.uniform(
        k_b, (out_features,), jnp.float32, -bound_b, bound_b)
    bias_rho = jnp.full((out_features,), -4.6, jnp.float32)
    return weight_mu, weight_rho, bias_mu, bias_rho


if __name__ == "__main__":
    # Small but tiling-exercising shapes: B=6 (padded to 8), IN=320, OUT=192.
    B, IN, OUT = 6, 320, 192

    key = jax.random.PRNGKey(0)
    k_init, k_x, k_ew, k_eb = jax.random.split(key, 4)

    weight_mu, weight_rho, bias_mu, bias_rho = init_params(k_init, IN, OUT)
    x = jax.random.normal(k_x, (B, IN), jnp.float32)
    # Reparameterization noise, sampled once (as in the PyTorch forward).
    # TODO(synk): noise is drawn in the wrapper (like torch.randn in forward);
    # an in-kernel pltpu.prng_random_bits path would avoid the extra HBM reads.
    eps_w = jax.random.normal(k_ew, (OUT, IN), jnp.float32)
    eps_b = jax.random.normal(k_eb, (OUT,), jnp.float32)

    # Small tiles here so the grid actually has multiple M/N/K steps; the
    # defaults (tm<=128, tn=256, tk=512) are the production choice.
    out = bayesian_linear_forward(
        x, weight_mu, weight_rho, eps_w, bias_mu, bias_rho, eps_b,
        tile_m=8, tile_n=128, tile_k=128)
    out = jax.block_until_ready(out)

    # pure-JAX reference for sanity
    w_ref = weight_mu + jnp.exp(weight_rho) * eps_w
    b_ref = bias_mu + jnp.exp(bias_rho) * eps_b
    ref = x @ w_ref.T + b_ref
    assert out.shape == (B, OUT)
    assert jnp.allclose(out, ref, atol=1e-4, rtol=1e-4)

    print("KERNEL_OK")
</pallas_src>

<mosaic_0001>
module attributes {stable_mosaic.version = 11 : i64} {
  func.func @bayesian_linear_kernel(%arg0: i32, %arg1: i32, %arg2: i32, %arg3: memref<8x128xf32, #tpu.memory_space<vmem>>, %arg4: memref<128x128xf32, #tpu.memory_space<vmem>>, %arg5: memref<128x128xf32, #tpu.memory_space<vmem>>, %arg6: memref<128x128xf32, #tpu.memory_space<vmem>>, %arg7: memref<1x128xf32, #tpu.memory_space<vmem>>, %arg8: memref<1x128xf32, #tpu.memory_space<vmem>>, %arg9: memref<1x128xf32, #tpu.memory_space<vmem>>, %arg10: memref<8x128xf32, #tpu.memory_space<vmem>>, %arg11: memref<8x128xf32, #tpu.memory_space<vmem>>) attributes {dimension_semantics = [#tpu.dimension_semantics<parallel>, #tpu.dimension_semantics<parallel>, #tpu.dimension_semantics<arbitrary>], iteration_bounds = array<i64: 1, 2, 3>, scalar_prefetch = 0 : i64, scratch_operands = 1 : i64, tpu.core_type = #tpu.core_type<tc>, window_params = [{transform_indices = @transform_0, window_bounds = array<i64: 8, 128>}, {transform_indices = @transform_1, window_bounds = array<i64: 128, 128>}, {transform_indices = @transform_2, window_bounds = array<i64: 128, 128>}, {transform_indices = @transform_3, window_bounds = array<i64: 128, 128>}, {transform_indices = @transform_4, window_bounds = array<i64: 1, 128>}, {transform_indices = @transform_5, window_bounds = array<i64: 1, 128>}, {transform_indices = @transform_6, window_bounds = array<i64: 1, 128>}, {transform_indices = @transform_7, window_bounds = array<i64: 8, 128>}]} {
    %c0_i32 = arith.constant 0 : i32
    %0 = arith.cmpi eq, %arg2, %c0_i32 : i32
    %1 = arith.extui %0 : i1 to i32
    %c0_i32_0 = arith.constant 0 : i32
    %2 = arith.cmpi ne, %1, %c0_i32_0 : i32
    scf.if %2 {
      %cst_13 = arith.constant 0.000000e+00 : f32
      %17 = vector.broadcast %cst_13 : f32 to vector<8x128xf32>
      %c0_14 = arith.constant 0 : index
      %c0_15 = arith.constant 0 : index
      %18 = vector.load %arg11[%c0_14, %c0_15] : memref<8x128xf32, #tpu.memory_space<vmem>>, vector<8x128xf32>
      tpu.vector_store %arg11[%c0_14, %c0_15], %17 {strides = array<i32>} : memref<8x128xf32, #tpu.memory_space<vmem>>, vector<8x128xf32>,
    } else {
    }
    %c0 = arith.constant 0 : index
    %c0_1 = arith.constant 0 : index
    %3 = vector.load %arg4[%c0, %c0_1] : memref<128x128xf32, #tpu.memory_space<vmem>>, vector<128x128xf32>
    %c0_2 = arith.constant 0 : index
    %c0_3 = arith.constant 0 : index
    %4 = vector.load %arg5[%c0_2, %c0_3] : memref<128x128xf32, #tpu.memory_space<vmem>>, vector<128x128xf32>
    %5 = math.exp %4 : vector<128x128xf32>
    %c0_4 = arith.constant 0 : index
    %c0_5 = arith.constant 0 : index
    %6 = vector.load %arg6[%c0_4, %c0_5] : memref<128x128xf32, #tpu.memory_space<vmem>>, vector<128x128xf32>
    %7 = arith.mulf %5, %6 : vector<128x128xf32>
    %8 = arith.addf %3, %7 : vector<128x128xf32>
    %c0_6 = arith.constant 0 : index
    %c0_7 = arith.constant 0 : index
    %9 = vector.load %arg11[%c0_6, %c0_7] : memref<8x128xf32, #tpu.memory_space<vmem>>, vector<8x128xf32>
    %c0_8 = arith.constant 0 : index
    %c0_9 = arith.constant 0 : index
    %10 = vector.load %arg3[%c0_8, %c0_9] : memref<8x128xf32, #tpu.memory_space<vmem>>, vector<8x128xf32>
    %cst = arith.constant dense<0.000000e+00> : vector<8x128xf32>
    %11 = tpu.matmul %10, %8, %cst {dimension_numbers = #tpu.dot_dimension_numbers<[1], [0], [0], [1], [0, 0, 1, 1], [], []>} : vector<8x128xf32>, vector<128x128xf32>, vector<8x128xf32> -> vector<8x128xf32>
    %12 = arith.addf %9, %11 : vector<8x128xf32>
    %c0_10 = arith.constant 0 : index
    %c0_11 = arith.constant 0 : index
    %13 = vector.load %arg11[%c0_10, %c0_11] : memref<8x128xf32, #tpu.memory_space<vmem>>, vector<8x128xf32>
    tpu.vector_store %arg11[%c0_10, %c0_11], %12 {strides = array<i32>} : memref<8x128xf32, #tpu.memory_space<vmem>>, vector<8x128xf32>,
    %c2_i32 = arith.constant 2 : i32
    %14 = arith.cmpi eq, %arg2, %c2_i32 : i32
    %15 = arith.extui %14 : i1 to i32
    %c0_i32_12 = arith.constant 0 : i32
    %16 = arith.cmpi ne, %15, %c0_i32_12 : i32
    scf.if %16 {
      %c0_13 = arith.constant 0 : index
      %c0_14 = arith.constant 0 : index
      %17 = vector.load %arg7[%c0_13, %c0_14] : memref<1x128xf32, #tpu.memory_space<vmem>>, vector<1x128xf32>
      %c0_15 = arith.constant 0 : index
      %c0_16 = arith.constant 0 : index
      %18 = vector.load %arg8[%c0_15, %c0_16] : memref<1x128xf32, #tpu.memory_space<vmem>>, vector<1x128xf32>
      %19 = math.exp %18 : vector<1x128xf32>
      %c0_17 = arith.constant 0 : index
      %c0_18 = arith.constant 0 : index
      %20 = vector.load %arg9[%c0_17, %c0_18] : memref<1x128xf32, #tpu.memory_space<vmem>>, vector<1x128xf32>
      %21 = arith.mulf %19, %20 : vector<1x128xf32>
      %22 = arith.addf %17, %21 : vector<1x128xf32>
      %c0_19 = arith.constant 0 : index
      %c0_20 = arith.constant 0 : index
      %23 = vector.load %arg11[%c0_19, %c0_20] : memref<8x128xf32, #tpu.memory_space<vmem>>, vector<8x128xf32>
      %24 = vector.broadcast %22 : vector<1x128xf32> to vector<8x128xf32>
      %25 = arith.addf %23, %24 : vector<8x128xf32>
      %c0_21 = arith.constant 0 : index
      %c0_22 = arith.constant 0 : index
      %26 = vector.load %arg10[%c0_21, %c0_22] : memref<8x128xf32, #tpu.memory_space<vmem>>, vector<8x128xf32>
      tpu.vector_store %arg10[%c0_21, %c0_22], %25 {strides = array<i32>} : memref<8x128xf32, #tpu.memory_space<vmem>>, vector<8x128xf32>,
    } else {
    }
    return
  }
  func.func @transform_0(%arg0: i32, %arg1: i32, %arg2: i32) -> (i32, i32) {
    %c0_i32 = arith.constant 0 : i32
    return %arg0, %arg2 : i32, i32
  }
  func.func @transform_1(%arg0: i32, %arg1: i32, %arg2: i32) -> (i32, i32) {
    %c0_i32 = arith.constant 0 : i32
    return %arg2, %arg1 : i32, i32
  }
  func.func @transform_2(%arg0: i32, %arg1: i32, %arg2: i32) -> (i32, i32) {
    %c0_i32 = arith.constant 0 : i32
    return %arg2, %arg1 : i32, i32
  }
  func.func @transform_3(%arg0: i32, %arg1: i32, %arg2: i32) -> (i32, i32) {
    %c0_i32 = arith.constant 0 : i32
    return %arg2, %arg1 : i32, i32
  }
  func.func @transform_4(%arg0: i32, %arg1: i32, %arg2: i32) -> (i32, i32) {
    %c0_i32 = arith.constant 0 : i32
    %c0_i32_0 = arith.constant 0 : i32
    return %c0_i32, %arg1 : i32, i32
  }
  func.func @transform_5(%arg0: i32, %arg1: i32, %arg2: i32) -> (i32, i32) {
    %c0_i32 = arith.constant 0 : i32
    %c0_i32_0 = arith.constant 0 : i32
    return %c0_i32, %arg1 : i32, i32
  }
  func.func @transform_6(%arg0: i32, %arg1: i32, %arg2: i32) -> (i32, i32) {
    %c0_i32 = arith.constant 0 : i32
    %c0_i32_0 = arith.constant 0 : i32
    return %c0_i32, %arg1 : i32, i32
  }
  func.func @transform_7(%arg0: i32, %arg1: i32, %arg2: i32) -> (i32, i32) {
    %c0_i32 = arith.constant 0 : i32
    return %arg0, %arg1 : i32, i32
  }
}

</mosaic_0001>

<bundles_post_ra>
// kernel: tpu_custom_call.1
= control target key start
LH: loop header
LB: loop body
LE: loop exit
PB: predicated region body
PF: predicated region fallthrough
CT: control target
= control target key end

     0   :  { %s1930_s0 = inlined_call_operand.hbm [shape: f32[8,384], index: 0, kind: input, shape index: {}]   ;;  %s1931_s1 = inlined_call_operand.hbm [shape: f32[384,256], index: 1, kind: input, shape index: {}]   ;;  %s1932_s2 = inlined_call_operand.hbm [shape: f32[384,256], index: 2, kind: input, shape index: {}]   ;;  %s1933_s3 = inlined_call_operand.hbm [shape: f32[384,256], index: 3, kind: input, shape index: {}]   ;;  %s1934_s4 = inlined_call_operand.vmem [shape: f32[1,256], index: 4, kind: input, shape index: {}]   ;;  %s1935_s5 = inlined_call_operand.vmem [shape: f32[1,256], index: 5, kind: input, shape index: {}]   ;;  %s1936_s6 = inlined_call_operand.vmem [shape: f32[1,256], index: 6, kind: input, shape index: {}]   ;;  %s1937_s7 = inlined_call_operand.hbm [shape: f32[8,256], index: 7, kind: output, shape index: {}]  }
   0x1   :  { %1959 = sst [smem:[#allocation30_spill]] %s1930_s0 }
   0x2   :  { %1960 = sst [smem:[#allocation31_spill]] %s1931_s1 }
   0x3   :  { %1961 = sst [smem:[#allocation32_spill]] %s1934_s4 }
   0x4   :  { %1962 = sst [smem:[#allocation33_spill]] %s1935_s5 }
   0x5   :  { %1963 = sst [smem:[#allocation34_spill]] %s1936_s6 }
   0x6   :  { %1964 = sst [smem:[#allocation35_spill]] %s1937_s7 }
   0x7   :  { %12 = vsyncpa [#allocation4], 0 }
   0x8   :  { %14 = vsyncpa [#allocation4 + $0x1], 0 }
   0x9   :  { %15 = vsyncpa [#allocation7], 0 }
   0xa   :  { %17 = vsyncpa [#allocation7 + $0x1], 0 }
   0xb   :  { %18 = vsyncpa [#allocation10], 0 }
   0xc   :  { %20 = vsyncpa [#allocation10 + $0x1], 0 }
   0xd   :  { %21 = vsyncpa [#allocation5], 0 }
   0xe   :  { %23 = vsyncpa [#allocation5 + $0x1], 0  ;;  %s1490_s24 = smov 0   ;;  %s1492_s25 = smov 0  }
   0xf   :  { %s1494_s26 = smov 0   ;;  %s1496_s27 = smov 0  }
  0x10   :  { %s1498_s28 = smov 0   ;;  %s1500_s29 = smov 0  }
  0x11   :  { %s1502_s30 = smov 0   ;;  %s1504_s8 = smov 0  }
  0x12   :  { %s1506_s9 = smov 0   ;;  %s1508_s10 = smov 0  }
  0x13   :  { %s1510_s11 = smov 0   ;;  %s1512_s12 = smov 0  }
  0x14   :  { %s1514_s13 = smov 0   ;;  %s1516_s14 = smov 0  }
  0x15 LB: > { %1965 = sst [smem:[#allocation16_spill]] %s1393_s26  ;;  %p65_p0 = scmp.eq.s32.totalorder %s1437_s14, 0  ;;  %s1437_s14 = sphi %s1516_s14, %s29_s14   ;;  %s1433_s13 = sphi %s1514_s13, %s2023_s13   ;;  %s1429_s12 = sphi %s1512_s12, %s2031_s12   ;;  %s1425_s11 = sphi %s1510_s11, %s2021_s11   ;;  %s1421_s10 = sphi %s1508_s10, %s2020_s10   ;;  %s1417_s9 = sphi %s1506_s9, %s2019_s9   ;;  %s1413_s8 = sphi %s1504_s8, %s2030_s8   ;;  %s1409_s30 = sphi %s1502_s30, %s2029_s30   ;;  %s1405_s29 = sphi %s1500_s29, %s2028_s29   ;;  %s1401_s28 = sphi %s1498_s28, %s2027_s28   ;;  %s1397_s27 = sphi %s1496_s27, %s2016_s27   ;;  %s1393_s26 = sphi %s1494_s26, %s2015_s26   ;;  %s1389_s25 = sphi %s1492_s25, %s2026_s25   ;;  %s1385_s24 = sphi %s1490_s24, %s2025_s24  }
  0x16   : > { %1966 = sst [smem:[#allocation17_spill]] %s1401_s28  ;;  %p92_p1 = scmp.ne.s32.totalorder %s1405_s29, %s1401_s28 }
  0x17   : > { %1967 = sst [smem:[#allocation18_spill]] %s1417_s9  ;;  %p1019_p2 = scmp.lt.s32.totalorder %s1437_s14, 6 }
  0x18   : > { %1968 = sst [smem:[#allocation19_spill]] %s1421_s10  ;;  %p94_p3 = por %p92_p1, %p65_p0 }
  0x19   : > { %1969 = sst [smem:[#allocation20_spill]] %s1425_s11  ;;  %s304_s17 = sand.u32 1, %s1437_s14  }
  0x1a   : > { %1970 = sst [smem:[#allocation21_spill]] %s1429_s12  ;;  %s1939_s18 = sand.u32 1, %s1405_s29  }
  0x1b   : > { %1971 = sst [smem:[#allocation22_spill]] %s1433_s13  ;;  %s1572_s19 = sshll.u32 %s1939_s18, 7 }
  0x1c   : > { %s937_s20 = sshll.u32 %s1429_s12, 5  ;;  %s308_s23 = scalar_lea.vmem [#allocation6], %s1572_s19 }
  0x1d   : > { %s314_s21 = sadd.s32 %s1433_s13, %s937_s20  ;;  %s317_s15 = sshll.u32 %s308_s23, 4  ;;  %s318_s15 = int_to_ptr.vmem [resolvable:$true] %s317_s15 }
  0x1e   : > { %s1576_s22 = sshll.u32 %s314_s21, 7  ;;  %s1972_s1 = sld [smem:[#allocation31_spill]] }
  0x1f   : > { %p1585_p4 = pnand %p1019_p2, %p94_p3  ;;  %p925_p5 = scmp.ge.s32.totalorder %s1437_s14, 1 }
  0x20   : > { %s1590_s18 = scalar_lea.sflag [#allocation7], %s304_s17  ;;  %s1186_s20 = scalar_lea.vmem %s318_s15, 2048 }
  0x21   : > { %p1951_p6 = pneg %p1585_p4  ;;  %p1187_p7 = scmp.ne.s32.totalorder %s318_s15, %s1186_s20 }
  0x22   : > { %s1439_s7 = smov [#allocation6]  }
  0x23   : > { %p1189_p8 = pnand %p1187_p7, %p1951_p6  ;;  %s1191_s10 = sshll.u32 %s1439_s7, 4  ;;  %s1192_s10 = int_to_ptr.vmem [resolvable:$false] %s1191_s10 }
  0x24   : > { %s316_s16 = scalar_lea.hbm %s1972_s1, %s1576_s22  ;;  %s1193_s21 = scalar_lea.vmem %s1192_s10, 4096 }
  0x25   : > { %p1190_p9 = pneg %p1189_p8  ;;  %p1194_p10 = scmp.lt.s32.totalorder %s318_s15, %s1192_s10 }
  0x26   : > { %p1195_p11 = scmp.lt.s32.totalorder %s1193_s21, %s1186_s20 }
  0x28   : > { %p1196_p12 = por %p1195_p11, %p1194_p10 }
  0x2a   : > { %p1197_p13 = pnand %p1196_p12, %p1190_p9 }
  0x2c   : > { %1200 = shalt.err (!%p1197_p13)
}
  0x2d   : > { %s1940_s23 = smov 256   ;;  %s1942_s17 = smov 128  }
  0x2e   : > { %s1944_s20 = smov 8   ;;  %p389_p1 = scmp.lt.s32.totalorder %s1437_s14, 7 }
  0x2f   : > { %1008 = dma.hbm_to_vmem [thread:$0]  (!%p1585_p4), %s316_s16, 2048, %s318_s15, %s1590_s18, %s1940_s23, %s1942_s17, %s1944_s20  }
  0x30   : > { %p1606_p3 = pnand %p925_p5, %p389_p1  ;;  %s1611_s10 = sadd.s32 4294967295, %s1437_s14  }
  0x31   : > { %s908_s21 = sadd.s32 4294967294, %s1437_s14   ;;  %s41_s1 = sadd.s32 1, %s1429_s12 }
  0x32   : > { %s57_s5 = sadd.s32 1, %s1417_s9  ;;  %p42_p7 = scmp.ge.s32.totalorder %s41_s1, 3 }
  0x33   : > { %p64_p8 = scmp.ne.s32.totalorder %s1417_s9, %s1413_s8  ;;  %p70_p9 = scmp.ne.s32.totalorder %s1413_s8, %s1409_s30 }
  0x34   : > { %p71_p10 = scmp.eq.s32.totalorder %s1611_s10, 0  ;;  %s2033_s1 = smov (%p42_p7, %s41_s1), 0 }
  0x35   : > { %1975 = sst [smem:[#allocation23_spill]] %s2033_s1  ;;  %s1976_s15 = sadd.s32 1, %s1433_s13 }
  0x36   : > { %s2035_s15 = smov (!%p42_p7, %s1976_s15), %s1433_s13  ;;  %s53_s16 = ssub.s32 %s1429_s12, %s2033_s1 }
  0x37   : > { %p1630_p5 = por %p65_p0, %p64_p8  ;;  %p46_p11 = scmp.ge.s32.totalorder %s2035_s15, 2 }
  0x38   : > { %p55_p12 = scmp.eq.s32.totalorder %s53_s16, 0  ;;  %p1634_p13 = por %p71_p10, %p70_p9 }
  0x39   : > { %p98_p1 = scmp.ne.s32.totalorder %s1401_s28, %s1397_s27  ;;  %s2037_s15 = smov (%p46_p11, %s2035_s15), 0 }
  0x3a   : > { %s1978_s30 = scalar_select %p1634_p13, 1, 0 }
  0x3b   : > { %1980 = sst [smem:[#allocation25_spill]] %s2037_s15  ;;  %s81_s20 = ssub.s32 %s1433_s13, %s2037_s15 }
  0x3c   : > { %1979 = sst [smem:[#allocation24_spill]] %s1978_s30  ;;  %p1647_p0 = por %p98_p1, %p71_p10 }
  0x3d   : > { %s1643_s17 = scalar_select %p55_p12, %s1417_s9, %s57_s5  }
  0x3e   : > { %s82_s4 = sor.u32 %s81_s20, %s53_s16  ;;  %p245_p7 = scmp.eq.s32.totalorder %s81_s20, 0 }
  0x3f   : > { %1981 = sst [smem:[#allocation26_spill]] %s1643_s17  ;;  %p83_p8 = scmp.eq.s32.totalorder %s82_s4, 0 }
  0x40   : > { %s247_s11 = sadd.s32 1, %s1393_s26  ;;  %s1984_s27 = sadd.s32 1, %s1405_s29 }
  0x41   : > { %s1653_s30 = scalar_select %p245_p7, %s1393_s26, %s247_s11  }
  0x42   : > { %s1658_s28 = scalar_select %p83_p8, %s1405_s29, %s1984_s27  }
  0x43   : > { %1983 = sst [smem:[#allocation27_spill]] %s1653_s30  ;;  %p257_p9 = scmp.ne.s32.totalorder %s1393_s26, %s1389_s25 }
  0x44   : > { %1985 = sst [smem:[#allocation28_spill]] %s1658_s28  ;;  %p258_p11 = scmp.eq.s32.totalorder %s1611_s10, 5 }
  0x45   : > { %p263_p12 = scmp.ne.s32.totalorder %s1389_s25, %s1385_s24  ;;  %p264_p6 = scmp.eq.s32.totalorder %s908_s21, 5 }
  0x46   : > { %p1665_p10 = por %p258_p11, %p257_p9  ;;  %s284_s16 = sand.u32 1, %s1417_s9  }
  0x47   : > { %p1670_p1 = por %p264_p6, %p263_p12  ;;  %s911_s20 = sshll.u32 %s284_s16, 3 }
  0x48   : > { %s1986_s5 = scalar_select %p1665_p10, 1, 0 }
  0x49   : > { %s1987_s4 = scalar_select %p1670_p1, 1, 0 }
  0x4a   : > { %s912_s11 = sshll.u32 %s1429_s12, 7  ;;  %s1989_s0 = sld [smem:[#allocation30_spill]] }
  0x4b   : > { %1988 = sst [smem:[#allocation29_spill]] %s1987_s4  ;;  %s288_s17 = scalar_lea.vmem [#allocation3], %s911_s20 }
  0x4c   : > { %s297_s28 = sshll.u32 %s288_s17, 4  ;;  %p1682_p7 = pnand %p1019_p2, %p1630_p5  ;;  %s298_s28 = int_to_ptr.vmem [resolvable:$true] %s297_s28 }
  0x4d   : > { %s339_s26 = scalar_lea.hbm %s1932_s2, %s1576_s22  ;;  %s285_s4 = scalar_lea.sflag [#allocation4], %s284_s16 }
  0x4e   : > { %p1203_p6 = pneg %p1682_p7  ;;  %s1214_s12 = scalar_lea.vmem %s298_s28, 128 }
  0x4f   : > { %p1215_p8 = scmp.ne.s32.totalorder %s298_s28, %s1214_s12  ;;  %s1443_s13 = smov [#allocation3]  }
  0x50   : > { %s295_s27 = scalar_lea.hbm %s1989_s0, %s912_s11  ;;  %s1219_s23 = sshll.u32 %s1443_s13, 4  ;;  %s1220_s23 = int_to_ptr.vmem [resolvable:$false] %s1219_s23 }
  0x51   : > { %p1217_p9 = pnand %p1215_p8, %p1203_p6  ;;  %s1221_s17 = scalar_lea.vmem %s1220_s23, 256 }
  0x52   : > { %p1222_p2 = scmp.lt.s32.totalorder %s298_s28, %s1220_s23  ;;  %p1223_p5 = scmp.lt.s32.totalorder %s1221_s17, %s1214_s12 }
  0x53   : > { %p1218_p11 = pneg %p1217_p9 }
  0x54   : > { %p1224_p12 = por %p1223_p5, %p1222_p2 }
  0x56   : > { %p1225_p1 = pnand %p1224_p12, %p1218_p11 }
  0x58   : > { %1228 = shalt.err (!%p1225_p1)
}
  0x59   : > { %1005 = dma.hbm_to_vmem [thread:$0]  (!%p1682_p7), %s295_s27, 128, %s298_s28, %s285_s4  }
  0x5a   : > { %s331_s9 = scalar_lea.vmem [#allocation8], %s1572_s19  ;;  %p1991_p8 = pneg %p1585_p4 }
  0x5b   : > { %s340_s15 = sshll.u32 %s331_s9, 4  ;;  %s1444_s16 = smov [#allocation8]   ;;  %s341_s15 = int_to_ptr.vmem [resolvable:$true] %s340_s15 }
  0x5c   : > { %s1242_s30 = scalar_lea.vmem %s341_s15, 2048  ;;  %s1247_s20 = sshll.u32 %s1444_s16, 4  ;;  %s1248_s20 = int_to_ptr.vmem [resolvable:$false] %s1247_s20 }
  0x5d   : > { %p1243_p6 = scmp.ne.s32.totalorder %s341_s15, %s1242_s30  ;;  %s1249_s12 = scalar_lea.vmem %s1248_s20, 4096 }
  0x5e   : > { %p1250_p11 = scmp.lt.s32.totalorder %s341_s15, %s1248_s20  ;;  %p1251_p1 = scmp.lt.s32.totalorder %s1249_s12, %s1242_s30 }
  0x5f   : > { %p1245_p9 = pnand %p1243_p6, %p1991_p8 }
  0x60   : > { %p1252_p2 = por %p1251_p1, %p1250_p11 }
  0x61   : > { %p1246_p10 = pneg %p1245_p9 }
  0x63   : > { %p1253_p5 = pnand %p1252_p2, %p1246_p10 }
  0x65   : > { %1256 = shalt.err (!%p1253_p5)
}
  0x66   : > { %s1992_s28 = smov 8   ;;  %s1993_s4 = smov 128  }
  0x67   : > { %s1994_s11 = smov 256   ;;  %s362_s17 = scalar_lea.hbm %s1933_s3, %s1576_s22 }
  0x68   : > { %1011 = dma.hbm_to_vmem [thread:$0]  (!%p1585_p4), %s339_s26, 2048, %s341_s15, %s1590_s18, %s1994_s11, %s1993_s4, %s1992_s28  }
  0x69   : > { %s354_s9 = scalar_lea.vmem [#allocation9], %s1572_s19  ;;  %s1995_s16 = sand.u32 1, %s1405_s29  }
  0x6a   : > { %s363_s30 = sshll.u32 %s354_s9, 4  ;;  %s351_s20 = scalar_lea.sflag [#allocation10], %s1995_s16  ;;  %s364_s30 = int_to_ptr.vmem [resolvable:$true] %s363_s30 }
  0x6b   : > { %s1270_s12 = scalar_lea.vmem %s364_s30, 2048  ;;  %p1996_p7 = pmov %p1991_p8 }
  0x6c   : > { %p1271_p10 = scmp.ne.s32.totalorder %s364_s30, %s1270_s12  ;;  %s1445_s27 = smov [#allocation9]  }
  0x6d   : > { %s1275_s21 = sshll.u32 %s1445_s27, 4  ;;  %s1276_s21 = int_to_ptr.vmem [resolvable:$false] %s1275_s21 }
  0x6e   : > { %p1273_p12 = pnand %p1271_p10, %p1996_p7  ;;  %s1277_s0 = scalar_lea.vmem %s1276_s21, 4096 }
  0x6f   : > { %p1278_p8 = scmp.lt.s32.totalorder %s364_s30, %s1276_s21  ;;  %p1279_p9 = scmp.lt.s32.totalorder %s1277_s0, %s1270_s12 }
  0x70   : > { %p1274_p6 = pneg %p1273_p12 }
  0x71   : > { %p1280_p11 = por %p1279_p9, %p1278_p8 }
  0x73   : > { %p1281_p1 = pnand %p1280_p11, %p1274_p6 }
  0x75   : > { %1284 = shalt.err (!%p1281_p1)
}
  0x76   : > { %1014 = dma.hbm_to_vmem [thread:$0]  (!%p1585_p4), %s362_s17, 2048, %s364_s30, %s351_s20, %s1994_s11, %s1993_s4, %s1992_s28  }
  0x77   : > { %393 = sbr.rel (%p1606_p3) target bundleno = 457 (0x1c9), region = 48  ;;  %s395_s18 = sand.u32 (!%p1606_p3), 1, %s1413_s8  }
  0x78   : > { %s1727_s19 = sshll.u32 (!%p1606_p3), %s395_s18, 3  ;;  %s396_s22 = scalar_lea.sflag (!%p1606_p3), [#allocation4], %s395_s18 }
  0x79   : > { %s399_s0 = scalar_lea.vmem (!%p1606_p3), [#allocation3], %s1727_s19 }
  0x7c   : > { %1368 = dma.done.wait (%p1634_p13), %s396_s22, 128  }
  0x7d   : > { %1370 = vsyncadd (%p1634_p13), %s396_s22, 4294967168  ;;  %s1998_s6 = sld [smem:[#allocation17_spill]]  ;;  %s404_s15 = sand.u32 1, %s1611_s10  }
  0x7e   : > { %s405_s4 = scalar_lea.sflag [#allocation7], %s404_s15 }
  0x83   : > { %s406_s28 = sand.u32 1, %s1998_s6  }
  0x84   : > { %s927_s7 = sshll.u32 %s406_s28, 7 }
  0x85   : > { %s1736_s11 = scalar_lea.vmem [#allocation6], %s927_s7 }
  0x86   : > { %1372 = dma.done.wait (%p1647_p0), %s405_s4, 4096  }
  0x87   : > { %1374 = vsyncadd (%p1647_p0), %s405_s4, 4294963200  ;;  %s1742_s13 = scalar_lea.vmem [#allocation8], %s927_s7  ;;  %s423_s23 = scalar_lea.sflag [#allocation10], %s406_s28 }
  0x88   : > { %s1744_s17 = scalar_lea.vmem [#allocation9], %s927_s7 }
  0x89   : > { %1376 = dma.done.wait (%p1647_p0), %s423_s23, 2048  }
  0x8a   : > { %1378 = vsyncadd (%p1647_p0), %s423_s23, 4294965248  ;;  %s1999_s10 = sld [smem:[#allocation20_spill]]  ;;  %s478_s9 = sand.u32 1, %s1389_s25  }
  0x8b   : > { %s1754_s30 = sshll.u32 %s478_s9, 3  ;;  %s2000_s12 = sld [smem:[#allocation32_spill]] }
  0x8c   : > { %s2001_s26 = sld [smem:[#allocation33_spill]]  ;;  %s480_s7 = scalar_lea.vmem [#allocation11], %s1754_s30 }
  0x8d   : > { %s2002_s15 = sld [smem:[#allocation34_spill]] }
  0x8e   : > { %s2003_s4 = sld [smem:[#allocation19_spill]] }
  0x90   : > { %p484_p4 = scmp.lt.s32.totalorder %s1999_s10, 1 }
  0x92   : > { %s2039_s10 = smov (!%p484_p4, %s1999_s10), 1 }
  0x93   : > { %s486_s1 = scalar_lea.vmem %s2000_s12, %s2039_s10  ;;  %s489_s18 = scalar_lea.vmem %s2001_s26, %s2039_s10 }
  0x94   : > { %s492_s28 = scalar_lea.vmem %s2002_s15, %s2039_s10  ;;  %p931_p3 = scmp.ne.s32.totalorder %s2003_s4, 0 }
  0x96   : > { %496 = sbr.rel (%p931_p3) target bundleno = 157 (0x9d), region = 68 }
  0x9b   : > { %v1446_v0 = vmov 0.0  }
  0x9c   : > { %497 = vst [vmem:[#allocation2] sm:$0xff] %v1446_v0 }
  0x9d PF: > { %v529_v1 = vld [vmem:[%s1742_s13 + $0x78] sm:$0xff]  ;;  %v1447_v2 = vmov 0.0   ;;  %v528_v4 = vld [vmem:[%s1742_s13 + $0x70] sm:$0xff]  ;;  %vm1448_vm0 = vmmov 0   ;;  %v527_v6 = vld [vmem:[%s1742_s13 + $0x68] sm:$0xff] }
  0x9e   : > { %957 = vmatprep.subr.mxu0 %v1447_v2  ;;  %v560_v3 = vmul.f32 1.442695, %v529_v1  ;;  %989 = vmatprep.mubr.msk.f32.mxu0 %vm1448_vm0, %v1447_v2  ;;  %v558_v5 = vmul.f32 1.442695, %v528_v4  ;;  %v556_v7 = vmul.f32 1.442695, %v527_v6 }
  0x9f   : > { %v526_v8 = vld [vmem:[%s1742_s13 + $0x60] sm:$0xff]  ;;  %v525_v10 = vld [vmem:[%s1742_s13 + $0x58] sm:$0xff]  ;;  %v524_v12 = vld [vmem:[%s1742_s13 + $0x50] sm:$0xff] }
  0xa0   : > { %1139 = vpow2.f32 %v560_v3  ;;  %v554_v9 = vmul.f32 1.442695, %v526_v8  ;;  %v552_v11 = vmul.f32 1.442695, %v525_v10  ;;  %v550_v13 = vmul.f32 1.442695, %v524_v12 }
  0xa1   : > { %1141 = vpow2.f32 %v558_v5  ;;  %v523_v14 = vld [vmem:[%s1742_s13 + $0x48] sm:$0xff]  ;;  %v522_v16 = vld [vmem:[%s1742_s13 + $0x40] sm:$0xff]  ;;  %v521_v18 = vld [vmem:[%s1742_s13 + $0x38] sm:$0xff] }
  0xa2   : > { %1143 = vpow2.f32 %v556_v7  ;;  %v548_v15 = vmul.f32 1.442695, %v523_v14  ;;  %v546_v17 = vmul.f32 1.442695, %v522_v16  ;;  %v544_v19 = vmul.f32 1.442695, %v521_v18 }
  0xa3   : > { %1145 = vpow2.f32 %v554_v9  ;;  %v520_v20 = vld [vmem:[%s1742_s13 + $0x30] sm:$0xff]  ;;  %v519_v21 = vld [vmem:[%s1742_s13 + $0x28] sm:$0xff]  ;;  %v518_v23 = vld [vmem:[%s1742_s13 + $0x20] sm:$0xff] }
  0xa4   : > { %1147 = vpow2.f32 %v552_v11  ;;  %v542_v22 = vmul.f32 1.442695, %v520_v20  ;;  %v540_v24 = vmul.f32 1.442695, %v519_v21  ;;  %v577_v25 = vld [vmem:[%s1744_s17 + $0x78] sm:$0xff]  ;;  %v576_v27 = vld [vmem:[%s1744_s17 + $0x70] sm:$0xff] }
  0xa5   : > { %1149 = vpow2.f32 %v550_v13  ;;  %v517_v26 = vld [vmem:[%s1742_s13 + $0x18] sm:$0xff]  ;;  %v538_v28 = vmul.f32 1.442695, %v518_v23  ;;  %v575_v31 = vld [vmem:[%s1744_s17 + $0x68] sm:$0xff]  ;;  %v516_v32 = vld [vmem:[%s1742_s13 + $0x10] sm:$0xff] }
  0xa6   : > { %1151 = vpow2.f32 %v548_v15  ;;  %v513_v30 = vld [vmem:[%s1736_s11 + $0x78] sm:$0xff]  ;;  %v512_v35 = vld [vmem:[%s1736_s11 + $0x70] sm:$0xff]  ;;  %v574_v36 = vld [vmem:[%s1744_s17 + $0x60] sm:$0xff]  ;;  %v536_v37 = vmul.f32 1.442695, %v517_v26 }
  0xa7   : > { %1153 = vpow2.f32 %v546_v17  ;;  %v511_v40 = vld [vmem:[%s1736_s11 + $0x68] sm:$0xff]  ;;  %v573_v41 = vld [vmem:[%s1744_s17 + $0x58] sm:$0xff]  ;;  %v534_v46 = vmul.f32 1.442695, %v516_v32  ;;  %v510_v49 = vld [vmem:[%s1736_s11 + $0x60] sm:$0xff] }
  0xa8   : > { %1155 = vpow2.f32 %v544_v19  ;;  %v515_v42 = vld [vmem:[%s1742_s13 + $0x8] sm:$0xff]  ;;  %v572_v51 = vld [vmem:[%s1744_s17 + $0x50] sm:$0xff]  ;;  %v514_v52 = vld [vmem:[%s1742_s13] sm:$0xff] }
  0xa9   : > { %1157 = vpow2.f32 %v542_v22  ;;  %v532_v56 = vmul.f32 1.442695, %v515_v42  ;;  %v509_v58 = vld [vmem:[%s1736_s11 + $0x58] sm:$0xff]  ;;  %v571_v59 = vld [vmem:[%s1744_s17 + $0x48] sm:$0xff]  ;;  %v530_v62 = vmul.f32 1.442695, %v514_v52 }
  0xaa   : > { %1159 = vpow2.f32 %v540_v24  ;;  %v508_v0 = vld [vmem:[%s1736_s11 + $0x50] sm:$0xff]  ;;  %v570_v1 = vld [vmem:[%s1744_s17 + $0x40] sm:$0xff]  ;;  %v507_v6 = vld [vmem:[%s1736_s11 + $0x48] sm:$0xff] }
  0xab   : > { %1161 = vpow2.f32 %v538_v28  ;;  %v569_v7 = vld [vmem:[%s1744_s17 + $0x38] sm:$0xff]  ;;  %v506_v11 = vld [vmem:[%s1736_s11 + $0x40] sm:$0xff]  ;;  %v568_v12 = vld [vmem:[%s1744_s17 + $0x30] sm:$0xff] }
  0xac   : > { %1163 = vpow2.f32 %v536_v37  ;;  %v505_v16 = vld [vmem:[%s1736_s11 + $0x38] sm:$0xff]  ;;  %v567_v17 = vld [vmem:[%s1744_s17 + $0x28] sm:$0xff]  ;;  %v504_v21 = vld [vmem:[%s1736_s11 + $0x30] sm:$0xff] }
  0xad   : > { %v1140_v29 = vpop.eup %1139  ;;  %1165 = vpow2.f32 %v534_v46  ;;  %v566_v22 = vld [vmem:[%s1744_s17 + $0x20] sm:$0xff]  ;;  %v503_v26 = vld [vmem:[%s1736_s11 + $0x28] sm:$0xff]  ;;  %v564_v32 = vld [vmem:[%s1744_s17 + $0x10] sm:$0xff] }
  0xae   : > { %v1142_v33 = vpop.eup %1141  ;;  %v593_v34 = vmul.f32 %v1140_v29, %v577_v25  ;;  %1167 = vpow2.f32 %v532_v56  ;;  %v563_v37 = vld [vmem:[%s1744_s17 + $0x8] sm:$0xff]  ;;  %v562_v42 = vld [vmem:[%s1744_s17] sm:$0xff] }
  0xaf   : > { %v1144_v38 = vpop.eup %1143  ;;  %v592_v39 = vmul.f32 %v1142_v33, %v576_v27  ;;  %1169 = vpow2.f32 %v530_v62  ;;  %v565_v27 = vld [vmem:[%s1744_s17 + $0x18] sm:$0xff]  ;;  %v610_v52 = vld [vmem:[#allocation2] sm:$0xff] }
  0xb0   : > { %v1146_v43 = vpop.eup %1145  ;;  %v609_v44 = vadd.f32 %v593_v34, %v513_v30  ;;  %v591_v45 = vmul.f32 %v1144_v38, %v575_v31  ;;  %v502_v31 = vld [vmem:[%s1736_s11 + $0x20] sm:$0xff] }
  0xb1   : > { %v1148_v47 = vpop.eup %1147  ;;  %v608_v48 = vadd.f32 %v592_v39, %v512_v35  ;;  %v590_v50 = vmul.f32 %v1146_v43, %v574_v36  ;;  %v501_v36 = vld [vmem:[%s1736_s11 + $0x18] sm:$0xff] }
  0xb2   : > { %v1150_v53 = vpop.eup %1149  ;;  %958 = vmatpush3.msra.mxu0 %v609_v44  ;;  %v607_v54 = vadd.f32 %v591_v45, %v511_v40  ;;  %v589_v55 = vmul.f32 %v1148_v47, %v573_v41  ;;  %v500_v41 = vld [vmem:[%s1736_s11 + $0x10] sm:$0xff]  ;;  %v499_v45 = vld [vmem:[%s1736_s11 + $0x8] sm:$0xff] }
  0xb3   : > { %v1152_v57 = vpop.eup %1151  ;;  %959 = vmatprep.subr.mxu0 %v1447_v2  ;;  %v606_v60 = vadd.f32 %v590_v50, %v510_v49  ;;  %v588_v61 = vmul.f32 %v1150_v53, %v572_v51  ;;  %v611_v51 = vld [vmem:[%s399_s0] sm:$0xff] }
  0xb4   : > { %960 = vmatpush3.msra.mxu0 %v608_v48  ;;  %v1154_v63 = vpop.eup %1153  ;;  %v605_v3 = vadd.f32 %v589_v55, %v509_v58  ;;  %v587_v4 = vmul.f32 %v1152_v57, %v571_v59  ;;  %v498_v48 = vld [vmem:[%s1736_s11] sm:$0xff]  ;;  %s2004_s11 = sld [smem:[#allocation19_spill]] }
  0xb5   : > { %961 = vmatprep.subr.mxu0 %v1447_v2  ;;  %v1156_v5 = vpop.eup %1155  ;;  %v604_v8 = vadd.f32 %v588_v61, %v508_v0  ;;  %v586_v9 = vmul.f32 %v1154_v63, %v570_v1 }
  0xb6   : > { %962 = vmatpush3.msra.mxu0 %v607_v54  ;;  %v1158_v10 = vpop.eup %1157  ;;  %v603_v13 = vadd.f32 %v587_v4, %v507_v6  ;;  %v585_v14 = vmul.f32 %v1156_v5, %v569_v7 }
  0xb7   : > { %963 = vmatprep.subr.mxu0 %v1447_v2  ;;  %v1160_v15 = vpop.eup %1159  ;;  %v602_v18 = vadd.f32 %v586_v9, %v506_v11  ;;  %v584_v19 = vmul.f32 %v1158_v10, %v568_v12 }
  0xb8   : > { %964 = vmatpush3.msra.mxu0 %v606_v60  ;;  %v1162_v20 = vpop.eup %1161  ;;  %v601_v23 = vadd.f32 %v585_v14, %v505_v16  ;;  %v583_v24 = vmul.f32 %v1160_v15, %v567_v17 }
  0xb9   : > { %965 = vmatprep.subr.mxu0 %v1447_v2  ;;  %v1164_v25 = vpop.eup %1163  ;;  %v600_v28 = vadd.f32 %v584_v19, %v504_v21  ;;  %v582_v29 = vmul.f32 %v1162_v20, %v566_v22 }
  0xba   : > { %966 = vmatpush3.msra.mxu0 %v605_v3  ;;  %v1166_v30 = vpop.eup %1165  ;;  %v599_v33 = vadd.f32 %v583_v24, %v503_v26  ;;  %v581_v34 = vmul.f32 %v1164_v25, %v565_v27  ;;  %p932_p13 = scmp.ne.s32.totalorder %s2004_s11, 2 }
  0xbb   : > { %967 = vmatprep.subr.mxu0 %v1447_v2  ;;  %v1168_v35 = vpop.eup %1167  ;;  %v598_v38 = vadd.f32 %v582_v29, %v502_v31  ;;  %v580_v39 = vmul.f32 %v1166_v30, %v564_v32 }
  0xbc   : > { %968 = vmatpush3.msra.mxu0 %v604_v8  ;;  %v1170_v40 = vpop.eup %1169  ;;  %v597_v43 = vadd.f32 %v581_v34, %v501_v36  ;;  %v579_v44 = vmul.f32 %v1168_v35, %v563_v37 }
  0xbd   : > { %969 = vmatprep.subr.mxu0 %v1447_v2  ;;  %v596_v46 = vadd.f32 %v580_v39, %v500_v41  ;;  %v578_v47 = vmul.f32 %v1170_v40, %v562_v42 }
  0xbe   : > { %970 = vmatpush3.msra.mxu0 %v603_v13  ;;  %v595_v49 = vadd.f32 %v579_v44, %v499_v45 }
  0xbf   : > { %971 = vmatprep.subr.mxu0 %v1447_v2  ;;  %v594_v50 = vadd.f32 %v578_v47, %v498_v48 }
  0xc0   : > { %972 = vmatpush3.msra.mxu0 %v602_v18 }
  0xc1   : > { %973 = vmatprep.subr.mxu0 %v1447_v2 }
  0xc2   : > { %974 = vmatpush3.msra.mxu0 %v601_v23 }
  0xc3   : > { %975 = vmatprep.subr.mxu0 %v1447_v2 }
  0xc4   : > { %976 = vmatpush3.msra.mxu0 %v600_v28 }
  0xc5   : > { %977 = vmatprep.subr.mxu0 %v1447_v2 }
  0xc6   : > { %978 = vmatpush3.msra.mxu0 %v599_v33 }
  0xc7   : > { %979 = vmatprep.subr.mxu0 %v1447_v2 }
  0xc8   : > { %980 = vmatpush3.msra.mxu0 %v598_v38 }
  0xc9   : > { %981 = vmatprep.subr.mxu0 %v1447_v2 }
  0xca   : > { %982 = vmatpush3.msra.mxu0 %v597_v43 }
  0xcb   : > { %983 = vmatprep.subr.mxu0 %v1447_v2 }
  0xcc   : > { %984 = vmatpush3.msra.mxu0 %v596_v46 }
  0xcd   : > { %985 = vmatprep.subr.mxu0 %v1447_v2 }
  0xce   : > { %986 = vmatpush3.msra.mxu0 %v595_v49 }
  0xcf   : > { %987 = vmatprep.subr.mxu0 %v1447_v2 }
  0xd0   : > { %988 = vmatpush3.msra.mxu0 %v594_v50 }
  0xd1   : > { %990 = vmatmul.mubr.f32.vlgmr.msra.gmra.mxu0 %v611_v51 }
 0x190   : > { %687 = sbr.rel (%p932_p13) target bundleno = 431 (0x1af), region = 72 }
 0x191   : > { %v678_v53 = vpop.f32.mrf.mxu0 }
 0x192   : > { %v682_v54 = vadd.f32 %v678_v53, %v610_v52 }
 0x193   : > { %v991_v55 = vpop.f32.mrf.mxu0 }
 0x194   : > { %683 = vst [vmem:[#allocation2] sm:$0xff] %v682_v54 }
 0x195   : > { %v689_v56 = vld [vmem:[%s489_s18] sm:$0x1]  ;;  %v697_v57 = vlaneseq }
 0x196   : > { %v690_v2 = vmul.f32 1.442695, %v689_v56  ;;  %v692_v59 = vld [vmem:[%s492_s28] sm:$0x1] }
 0x197   : > { %v698_v58 = vshrl.u32 %v697_v57, 7  ;;  %v688_v61 = vld [vmem:[%s486_s1] sm:$0x1] }
 0x198   : > { %1171 = vpow2.f32 %v690_v2 }
 0x199   : > { %v699_v63 = vsub.s32 0, %v698_v58 }
 0x19b   : > { %v695_v1 = vld [vmem:[#allocation2] sm:$0xff] }
 0x1a5   : > { %v1172_v60 = vpop.eup %1171 }
 0x1a6   : > { %v693_v62 = vmul.f32 %v1172_v60, %v692_v59 }
 0x1a8   : > { %v694_v0 = vadd.f32 %v693_v62, %v688_v61 }
 0x1aa   : > { %v700_v3 = vrot.slane %v694_v0, %v699_v63 }
 0x1ac   : > { %v702_v4 = vadd.f32 %v700_v3, %v695_v1 }
 0x1ae   : > { %703 = vst [vmem:[%s480_s7] sm:$0xff] %v702_v4 }
 0x1af PF: > { %s2008_s21 = sld [smem:[#allocation20_spill]]  ;;  %s720_s10 = sshll.u32 %s480_s7, 4  ;;  %s721_s10 = int_to_ptr.vmem [resolvable:$true] %s720_s10 }
 0x1b0   : > { %s2009_s6 = sld [smem:[#allocation35_spill]]  ;;  %s705_s1 = scalar_lea.sflag [#allocation5], %s478_s9 }
 0x1b1   : > { %s1285_s28 = scalar_lea.vmem %s721_s10, 128  ;;  %p2010_p2 = scmp.ne.s32.totalorder %s1986_s5, 0 }
 0x1b2   : > { %p1286_p0 = scmp.ne.s32.totalorder %s721_s10, %s1285_s28  ;;  %s1449_s4 = smov [#allocation11]  }
 0x1b3   : > { %s1289_s11 = sshll.u32 %s1449_s4, 4  ;;  %s1290_s11 = int_to_ptr.vmem [resolvable:$false] %s1289_s11 }
 0x1b4   : > { %p1287_p5 = pnand %p1286_p0, %p2010_p2  ;;  %s1291_s13 = scalar_lea.vmem %s1290_s11, 256 }
 0x1b5   : > { %s934_s26 = sshll.u32 %s2008_s21, 7  ;;  %p1292_p7 = scmp.lt.s32.totalorder %s721_s10, %s1290_s11 }
 0x1b6   : > { %s718_s15 = scalar_lea.hbm %s2009_s6, %s934_s26  ;;  %p1288_p10 = pneg %p1287_p5 }
 0x1b7   : > { %p1293_p12 = scmp.lt.s32.totalorder %s1291_s13, %s1285_s28 }
 0x1b9   : > { %p1294_p6 = por %p1293_p12, %p1292_p7 }
 0x1bb   : > { %p1295_p8 = pnand %p1294_p6, %p1288_p10 }
 0x1bd   : > { %1298 = shalt.err (!%p1295_p8)
}
 0x1be   : > { %s1299_s23 = scalar_lea.hbm %s718_s15, 128  ;;  %s1303_s7 = scalar_lea.hbm %s2009_s6, 256 }
 0x1bf   : > { %p1300_p9 = scmp.ne.s32.totalorder %s718_s15, %s1299_s23  ;;  %p1304_p4 = scmp.lt.s32.totalorder %s718_s15, %s2009_s6 }
 0x1c0   : > { %p1305_p3 = scmp.lt.s32.totalorder %s1303_s7, %s1299_s23 }
 0x1c1   : > { %p1301_p11 = pnand %p1300_p9, %p2010_p2 }
 0x1c2   : > { %p1306_p13 = por %p1305_p3, %p1304_p4 }
 0x1c3   : > { %p1302_p1 = pneg %p1301_p11 }
 0x1c5   : > { %p1307_p0 = pnand %p1306_p13, %p1302_p1 }
 0x1c7   : > { %1310 = shalt.err (!%p1307_p0)
}
 0x1c8   : > { %1000 = dma.vmem_to_hbm [thread:$0]  (%p2010_p2), %s721_s10, 128, %s718_s15, %s705_s1  }
 0x1c9 PF: > { %s2011_s0 = sld [smem:[#allocation29_spill]]  ;;  %p1020_p5 = scmp.ge.s32.totalorder %s1437_s14, 2 }
 0x1ca   : > { %s732_s16 = sand.u32 1, %s1385_s24  }
 0x1cb   : > { %s733_s20 = scalar_lea.sflag [#allocation5], %s732_s16 }
 0x1cf   : > { %p2012_p10 = scmp.ne.s32.totalorder %s2011_s0, 0 }
 0x1d1   : > { %p1016_p7 = pnand %p1020_p5, %p2012_p10 }
 0x1d3   : > { %p1017_p12 = pneg %p1016_p7 }
 0x1d5   : > { %1380 = dma.done.wait (%p1017_p12), %s733_s20, 128  }
 0x1d6   : > { %1382 = vsyncadd (%p1017_p12), %s733_s20, 4294967168  ;;  %s29_s14 = sadd.s32 1, %s1437_s14   ;;  %s2014_s5 = sld [smem:[#allocation16_spill]] }
 0x1d7   : > { %p1883_p6 = scmp.ge.s32.totalorder %s29_s14, 8   ;;  %s2015_s26 = sld [smem:[#allocation27_spill]] }
 0x1d8   : > { %s2016_s27 = sld [smem:[#allocation17_spill]]  ;;  %s2025_s24 = smov %s1389_s25 }
 0x1d9   : > { %s2017_s21 = sld [smem:[#allocation28_spill]]  ;;  %s2027_s28 = smov %s1405_s29 }
 0x1da   : > { %s2018_s18 = sld [smem:[#allocation18_spill]]  ;;  %s2029_s30 = smov %s1413_s8 }
 0x1db   : > { %s2019_s9 = sld [smem:[#allocation26_spill]] }
 0x1dc   : > { %s2020_s10 = sld [smem:[#allocation21_spill]]  ;;  %s2026_s25 = smov %s2014_s5 }
 0x1dd   : > { %s2021_s11 = sld [smem:[#allocation22_spill]] }
 0x1de   : > { %s2022_s22 = sld [smem:[#allocation23_spill]] }
 0x1df   : > { %s2023_s13 = sld [smem:[#allocation25_spill]]  ;;  %s2028_s29 = smov %s2017_s21 }
 0x1e0   : > { %s2030_s8 = smov %s2018_s18  ;;  %28 = sbr.rel (!%p1883_p6) target bundleno = 21 (0x15), region = 147 }
 0x1e4   : > { %s2031_s12 = smov %s2022_s22 }
 0x1e5   :  { %738 = vsyncpa [#allocation4], 1 }
 0x1e6   :  { %740 = vsyncpa [#allocation4 + $0x1], 1 }
 0x1e7   :  { %741 = vsyncpa [#allocation7], 1 }
 0x1e8   :  { %743 = vsyncpa [#allocation7 + $0x1], 1 }
 0x1e9   :  { %744 = vsyncpa [#allocation10], 1 }
 0x1ea   :  { %746 = vsyncpa [#allocation10 + $0x1], 1 }
 0x1eb   :  { %747 = vsyncpa [#allocation5], 1 }
 0x1ec   :  { %749 = vsyncpa [#allocation5 + $0x1], 1 }

</bundles_post_ra>
